<compile_context>
chip_gen: v7x
topology: tpu7x:2x2x1
jax: 0.10.0
libtpu: 0.0.40
codegen_flags: <defaults>
</compile_context>

<pallas_src>
import jax
import jax.numpy as jnp
from jax import lax
from jax.experimental import pallas as pl
from jax.experimental.pallas import tpu as pltpu

BN_EPS = 1e-5
N_LAYERS = 5


def _fused_conv_bn_relu_kernel(*refs):
    """Five fused (1x1 conv + folded BN + ReLU) blocks, one row-tile each.

    refs = (x_1..x_5, w_eff_1..w_eff_5, b_eff_1..b_eff_5, out_1..out_5)
      x_i    : (Cin_i, TR)    activation tile, H*W on lanes
      w_eff_i: (Cout, Cin_i)  BN-folded conv weight (VMEM resident)
      b_eff_i: (Cout, 1)      BN-folded bias (VMEM resident)
      out_i  : (Cout, TR)     lane-dense output tile
    """
    xs = refs[0:N_LAYERS]
    ws = refs[N_LAYERS:2 * N_LAYERS]
    bs = refs[2 * N_LAYERS:3 * N_LAYERS]
    outs = refs[3 * N_LAYERS:4 * N_LAYERS]
    for x_ref, w_ref, b_ref, o_ref in zip(xs, ws, bs, outs):
        y = jnp.dot(w_ref[...], x_ref[...],
                    preferred_element_type=jnp.float32)   # MXU
        y = y + b_ref[...]                                # VPU, lane-broadcast
        o_ref[...] = jnp.maximum(y, 0.0).astype(o_ref.dtype)


def _choose_row_tile(hw, total_channels, vmem_budget_bytes=8 << 20):
    """Largest multiple-of-128 divisor of H*W that keeps the double-buffered
    per-step working set (all five inputs + outputs, f32) within budget."""
    if hw % 128 != 0:
        return hw  # full-extent block is always legal (no (8,128) constraint)
    bytes_per_row = max(total_channels * 4 * 2, 1)       # f32, double-buffered
    cap = min(hw, 2048, max(128, vmem_budget_bytes // bytes_per_row))
    t = cap - (cap % 128)
    while t >= 128:
        if hw % t == 0:
            return t
        t -= 128
    return hw


def _fold_bn_into_conv(x3d, w, gamma, beta):
    """Fold training-mode BatchNorm2d batch statistics into the 1x1 conv.

    x3d: (N, Cin, H*W) f32, w: (Cout, Cin), gamma/beta: (Cout,)
    Returns (w_eff (Cout, Cin), b_eff (Cout, 1)).

    The conv bias is a mathematical no-op under training-mode BN (cancelled
    by the mean subtraction) and therefore never enters the effective params.
    """
    n, cin, hw = x3d.shape
    r = n * hw
    mean_x = jnp.sum(x3d, axis=(0, 2)) / r                          # (Cin,)
    exx = jnp.einsum("nch,ndh->cd", x3d, x3d,
                     precision=lax.Precision.HIGHEST) / r           # (Cin,Cin)
    cov = exx - mean_x[:, None] * mean_x[None, :]
    var_y = jnp.einsum("oc,cd,od->o", w, cov, w,
                       precision=lax.Precision.HIGHEST)             # (Cout,)
    var_y = jnp.maximum(var_y, 0.0)                                 # fp safety
    scale = gamma * lax.rsqrt(var_y + BN_EPS)                       # (Cout,)
    w_eff = scale[:, None] * w                                      # (Cout,Cin)
    b_eff = beta - scale * (w @ mean_x)                             # (Cout,)
    return w_eff, b_eff[:, None]


@jax.jit
def one_conv_forward(params, x1, x2, x3, x4, x5):
    """oneConv.forward: five independent ConvBatchNorm_one blocks, fused."""
    xs = (x1, x2, x3, x4, x5)
    n, _, h, wd = xs[0].shape
    hw = h * wd
    cout = params[0][0].shape[0]
    total_ch = sum(x.shape[1] for x in xs) + N_LAYERS * cout
    tr = _choose_row_tile(hw, total_ch)
    grid = (n, hw // tr)

    xs3d, w_effs, b_effs = [], [], []
    for x, (w, _b, gamma, beta) in zip(xs, params):   # conv bias cancels
        x3d = x.reshape(x.shape[0], x.shape[1], hw)   # NCHW kept, no transpose
        w_eff, b_eff = _fold_bn_into_conv(x3d, w, gamma, beta)
        xs3d.append(x3d)
        w_effs.append(w_eff)
        b_effs.append(b_eff)

    x_specs = [pl.BlockSpec((None, x3d.shape[1], tr), lambda ni, ri: (ni, 0, ri))
               for x3d in xs3d]
    w_specs = [pl.BlockSpec(w.shape, lambda ni, ri: (0, 0)) for w in w_effs]
    b_specs = [pl.BlockSpec(b.shape, lambda ni, ri: (0, 0)) for b in b_effs]
    out_specs = [pl.BlockSpec((None, cout, tr), lambda ni, ri: (ni, 0, ri))
                 for _ in range(N_LAYERS)]
    out_shape = tuple(jax.ShapeDtypeStruct((n, cout, hw), jnp.float32)
                      for _ in range(N_LAYERS))

    outs = pl.pallas_call(
        _fused_conv_bn_relu_kernel,
        out_shape=out_shape,
        grid=grid,
        in_specs=x_specs + w_specs + b_specs,
        out_specs=out_specs,
        compiler_params=pltpu.CompilerParams(
            dimension_semantics=("parallel", "parallel")),
    )(*xs3d, *w_effs, *b_effs)

    return tuple(o.reshape(n, cout, h, wd) for o in outs)


def init_layer_params(key, cin, cout):
    """Deterministic synthetic params matching PyTorch defaults.

    Conv2d(cin, cout, 1): weight (cout, cin), bias (cout,), both
    U(-1/sqrt(cin), 1/sqrt(cin)).  BatchNorm2d: gamma=1, beta=0.
    (The conv bias is kept for module fidelity but is cancelled by
    training-mode BN and never reaches the kernel.)
    """
    kw, kb = jax.random.split(key)
    bound = 1.0 / (cin ** 0.5)
    w = jax.random.uniform(kw, (cout, cin), jnp.float32, -bound, bound)
    b = jax.random.uniform(kb, (cout,), jnp.float32, -bound, bound)
    gamma = jnp.ones((cout,), jnp.float32)
    beta = jnp.zeros((cout,), jnp.float32)
    return w, b, gamma, beta


def _reference_layer(x, w, b, gamma, beta):
    """Pure-JAX reference: 1x1 conv + training-mode BN (batch stats) + ReLU."""
    y = jnp.einsum("oc,nchw->nohw", w, x,
                   precision=lax.Precision.HIGHEST) + b[None, :, None, None]
    mean = jnp.mean(y, axis=(0, 2, 3), keepdims=True)
    var = jnp.mean((y - mean) ** 2, axis=(0, 2, 3), keepdims=True)
    y_hat = (y - mean) * lax.rsqrt(var + BN_EPS)
    out = y_hat * gamma[None, :, None, None] + beta[None, :, None, None]
    return jnp.maximum(out, 0.0)


if __name__ == "__main__":
    key = jax.random.PRNGKey(0)

    N, C, H, W = 2, 4, 16, 16     # batch=2, in_channels=4, spatial=16
    COUT = 4                      # out_channels=4
    in_chans = [C, 2 * C, 4 * C, 8 * C, 8 * C]

    k_inputs, k_params = jax.random.split(key)
    in_keys = jax.random.split(k_inputs, N_LAYERS)
    p_keys = jax.random.split(k_params, N_LAYERS)

    xs = [jax.random.normal(in_keys[i], (N, in_chans[i], H, W), jnp.float32)
          for i in range(N_LAYERS)]
    params = [init_layer_params(p_keys[i], in_chans[i], COUT)
              for i in range(N_LAYERS)]

    outs = one_conv_forward(params, *xs)
    outs = jax.block_until_ready(outs)

    # sanity: shape, ReLU non-negativity, finiteness, and numerical match
    # against a pure-JAX conv -> batch-stat BN -> ReLU reference.
    # TODO(synk): BatchNorm2d running_mean/running_var state updates (train-
    # mode side effect) are not reproduced; only forward outputs are computed.
    for x, p, em in zip(xs, params, outs):
        assert em.shape == (N, COUT, H, W), em.shape
        assert bool(jnp.all(em >= 0.0))
        assert bool(jnp.all(jnp.isfinite(em)))
        ref = _reference_layer(x, *p)
        assert bool(jnp.allclose(em, ref, rtol=2e-2, atol=2e-2)), (
            float(jnp.max(jnp.abs(em - ref))))

    print("KERNEL_OK")
</pallas_src>

<mosaic_0001>
module attributes {stable_mosaic.version = 11 : i64} {
  func.func @_fused_conv_bn_relu_kernel(%arg0: i32, %arg1: i32, %arg2: memref<1x4x256xf32, #tpu.memory_space<vmem>>, %arg3: memref<1x8x256xf32, #tpu.memory_space<vmem>>, %arg4: memref<1x16x256xf32, #tpu.memory_space<vmem>>, %arg5: memref<1x32x256xf32, #tpu.memory_space<vmem>>, %arg6: memref<1x32x256xf32, #tpu.memory_space<vmem>>, %arg7: memref<4x4xf32, #tpu.memory_space<vmem>>, %arg8: memref<4x8xf32, #tpu.memory_space<vmem>>, %arg9: memref<4x16xf32, #tpu.memory_space<vmem>>, %arg10: memref<4x32xf32, #tpu.memory_space<vmem>>, %arg11: memref<4x32xf32, #tpu.memory_space<vmem>>, %arg12: memref<4x1xf32, #tpu.memory_space<vmem>>, %arg13: memref<4x1xf32, #tpu.memory_space<vmem>>, %arg14: memref<4x1xf32, #tpu.memory_space<vmem>>, %arg15: memref<4x1xf32, #tpu.memory_space<vmem>>, %arg16: memref<4x1xf32, #tpu.memory_space<vmem>>, %arg17: memref<1x4x256xf32, #tpu.memory_space<vmem>>, %arg18: memref<1x4x256xf32, #tpu.memory_space<vmem>>, %arg19: memref<1x4x256xf32, #tpu.memory_space<vmem>>, %arg20: memref<1x4x256xf32, #tpu.memory_space<vmem>>, %arg21: memref<1x4x256xf32, #tpu.memory_space<vmem>>) attributes {dimension_semantics = [#tpu.dimension_semantics<parallel>, #tpu.dimension_semantics<parallel>], iteration_bounds = array<i64: 2, 1>, scalar_prefetch = 0 : i64, scratch_operands = 0 : i64, tpu.core_type = #tpu.core_type<tc>, window_params = [{transform_indices = @transform_0, window_bounds = array<i64: 1, 4, 256>}, {transform_indices = @transform_1, window_bounds = array<i64: 1, 8, 256>}, {transform_indices = @transform_2, window_bounds = array<i64: 1, 16, 256>}, {transform_indices = @transform_3, window_bounds = array<i64: 1, 32, 256>}, {transform_indices = @transform_4, window_bounds = array<i64: 1, 32, 256>}, {pipeline_mode = #tpu.pipeline_mode<synchronous>, transform_indices = @transform_5, window_bounds = array<i64: 4, 4>}, {pipeline_mode = #tpu.pipeline_mode<synchronous>, transform_indices = @transform_6, window_bounds = array<i64: 4, 8>}, {pipeline_mode = #tpu.pipeline_mode<synchronous>, transform_indices = @transform_7, window_bounds = array<i64: 4, 16>}, {pipeline_mode = #tpu.pipeline_mode<synchronous>, transform_indices = @transform_8, window_bounds = array<i64: 4, 32>}, {pipeline_mode = #tpu.pipeline_mode<synchronous>, transform_indices = @transform_9, window_bounds = array<i64: 4, 32>}, {pipeline_mode = #tpu.pipeline_mode<synchronous>, transform_indices = @transform_10, window_bounds = array<i64: 4, 1>}, {pipeline_mode = #tpu.pipeline_mode<synchronous>, transform_indices = @transform_11, window_bounds = array<i64: 4, 1>}, {pipeline_mode = #tpu.pipeline_mode<synchronous>, transform_indices = @transform_12, window_bounds = array<i64: 4, 1>}, {pipeline_mode = #tpu.pipeline_mode<synchronous>, transform_indices = @transform_13, window_bounds = array<i64: 4, 1>}, {pipeline_mode = #tpu.pipeline_mode<synchronous>, transform_indices = @transform_14, window_bounds = array<i64: 4, 1>}, {transform_indices = @transform_15, window_bounds = array<i64: 1, 4, 256>}, {transform_indices = @transform_16, window_bounds = array<i64: 1, 4, 256>}, {transform_indices = @transform_17, window_bounds = array<i64: 1, 4, 256>}, {transform_indices = @transform_18, window_bounds = array<i64: 1, 4, 256>}, {transform_indices = @transform_19, window_bounds = array<i64: 1, 4, 256>}]} {
    %c0 = arith.constant 0 : index
    %c0_0 = arith.constant 0 : index
    %0 = vector.load %arg7[%c0, %c0_0] : memref<4x4xf32, #tpu.memory_space<vmem>>, vector<4x4xf32>
    %c0_1 = arith.constant 0 : index
    %c0_2 = arith.constant 0 : index
    %c0_3 = arith.constant 0 : index
    %1 = vector.load %arg2[%c0_1, %c0_2, %c0_3] : memref<1x4x256xf32, #tpu.memory_space<vmem>>, vector<1x4x256xf32>
    %2 = vector.shape_cast %1 : vector<1x4x256xf32> to vector<4x256xf32>
    %cst = arith.constant dense<0.000000e+00> : vector<4x256xf32>
    %3 = tpu.matmul %0, %2, %cst {dimension_numbers = #tpu.dot_dimension_numbers<[1], [0], [0], [1], [0, 0, 1, 1], [], []>} : vector<4x4xf32>, vector<4x256xf32>, vector<4x256xf32> -> vector<4x256xf32>
    %c0_4 = arith.constant 0 : index
    %c0_5 = arith.constant 0 : index
    %4 = vector.load %arg12[%c0_4, %c0_5] : memref<4x1xf32, #tpu.memory_space<vmem>>, vector<4x1xf32>
    %5 = vector.broadcast %4 : vector<4x1xf32> to vector<4x256xf32>
    %6 = arith.addf %3, %5 : vector<4x256xf32>
    %cst_6 = arith.constant 0.000000e+00 : f32
    %7 = vector.broadcast %cst_6 : f32 to vector<4x256xf32>
    %8 = arith.maximumf %6, %7 : vector<4x256xf32>
    %c0_7 = arith.constant 0 : index
    %c0_8 = arith.constant 0 : index
    %c0_9 = arith.constant 0 : index
    %9 = vector.load %arg17[%c0_7, %c0_8, %c0_9] : memref<1x4x256xf32, #tpu.memory_space<vmem>>, vector<1x4x256xf32>
    %10 = vector.shape_cast %9 : vector<1x4x256xf32> to vector<4x256xf32>
    %11 = vector.shape_cast %8 : vector<4x256xf32> to vector<1x4x256xf32>
    tpu.vector_store %arg17[%c0_7, %c0_8, %c0_9], %11 {strides = array<i32>} : memref<1x4x256xf32, #tpu.memory_space<vmem>>, vector<1x4x256xf32>,
    %c0_10 = arith.constant 0 : index
    %c0_11 = arith.constant 0 : index
    %12 = vector.load %arg8[%c0_10, %c0_11] : memref<4x8xf32, #tpu.memory_space<vmem>>, vector<4x8xf32>
    %c0_12 = arith.constant 0 : index
    %c0_13 = arith.constant 0 : index
    %c0_14 = arith.constant 0 : index
    %13 = vector.load %arg3[%c0_12, %c0_13, %c0_14] : memref<1x8x256xf32, #tpu.memory_space<vmem>>, vector<1x8x256xf32>
    %14 = vector.shape_cast %13 : vector<1x8x256xf32> to vector<8x256xf32>
    %cst_15 = arith.constant dense<0.000000e+00> : vector<4x256xf32>
    %15 = tpu.matmul %12, %14, %cst_15 {dimension_numbers = #tpu.dot_dimension_numbers<[1], [0], [0], [1], [0, 0, 1, 1], [], []>} : vector<4x8xf32>, vector<8x256xf32>, vector<4x256xf32> -> vector<4x256xf32>
    %c0_16 = arith.constant 0 : index
    %c0_17 = arith.constant 0 : index
    %16 = vector.load %arg13[%c0_16, %c0_17] : memref<4x1xf32, #tpu.memory_space<vmem>>, vector<4x1xf32>
    %17 = vector.broadcast %16 : vector<4x1xf32> to vector<4x256xf32>
    %18 = arith.addf %15, %17 : vector<4x256xf32>
    %cst_18 = arith.constant 0.000000e+00 : f32
    %19 = vector.broadcast %cst_18 : f32 to vector<4x256xf32>
    %20 = arith.maximumf %18, %19 : vector<4x256xf32>
    %c0_19 = arith.constant 0 : index
    %c0_20 = arith.constant 0 : index
    %c0_21 = arith.constant 0 : index
    %21 = vector.load %arg18[%c0_19, %c0_20, %c0_21] : memref<1x4x256xf32, #tpu.memory_space<vmem>>, vector<1x4x256xf32>
    %22 = vector.shape_cast %21 : vector<1x4x256xf32> to vector<4x256xf32>
    %23 = vector.shape_cast %20 : vector<4x256xf32> to vector<1x4x256xf32>
    tpu.vector_store %arg18[%c0_19, %c0_20, %c0_21], %23 {strides = array<i32>} : memref<1x4x256xf32, #tpu.memory_space<vmem>>, vector<1x4x256xf32>,
    %c0_22 = arith.constant 0 : index
    %c0_23 = arith.constant 0 : index
    %24 = vector.load %arg9[%c0_22, %c0_23] : memref<4x16xf32, #tpu.memory_space<vmem>>, vector<4x16xf32>
    %c0_24 = arith.constant 0 : index
    %c0_25 = arith.constant 0 : index
    %c0_26 = arith.constant 0 : index
    %25 = vector.load %arg4[%c0_24, %c0_25, %c0_26] : memref<1x16x256xf32, #tpu.memory_space<vmem>>, vector<1x16x256xf32>
    %26 = vector.shape_cast %25 : vector<1x16x256xf32> to vector<16x256xf32>
    %cst_27 = arith.constant dense<0.000000e+00> : vector<4x256xf32>
    %27 = tpu.matmul %24, %26, %cst_27 {dimension_numbers = #tpu.dot_dimension_numbers<[1], [0], [0], [1], [0, 0, 1, 1], [], []>} : vector<4x16xf32>, vector<16x256xf32>, vector<4x256xf32> -> vector<4x256xf32>
    %c0_28 = arith.constant 0 : index
    %c0_29 = arith.constant 0 : index
    %28 = vector.load %arg14[%c0_28, %c0_29] : memref<4x1xf32, #tpu.memory_space<vmem>>, vector<4x1xf32>
    %29 = vector.broadcast %28 : vector<4x1xf32> to vector<4x256xf32>
    %30 = arith.addf %27, %29 : vector<4x256xf32>
    %cst_30 = arith.constant 0.000000e+00 : f32
    %31 = vector.broadcast %cst_30 : f32 to vector<4x256xf32>
    %32 = arith.maximumf %30, %31 : vector<4x256xf32>
    %c0_31 = arith.constant 0 : index
    %c0_32 = arith.constant 0 : index
    %c0_33 = arith.constant 0 : index
    %33 = vector.load %arg19[%c0_31, %c0_32, %c0_33] : memref<1x4x256xf32, #tpu.memory_space<vmem>>, vector<1x4x256xf32>
    %34 = vector.shape_cast %33 : vector<1x4x256xf32> to vector<4x256xf32>
    %35 = vector.shape_cast %32 : vector<4x256xf32> to vector<1x4x256xf32>
    tpu.vector_store %arg19[%c0_31, %c0_32, %c0_33], %35 {strides = array<i32>} : memref<1x4x256xf32, #tpu.memory_space<vmem>>, vector<1x4x256xf32>,
    %c0_34 = arith.constant 0 : index
    %c0_35 = arith.constant 0 : index
    %36 = vector.load %arg10[%c0_34, %c0_35] : memref<4x32xf32, #tpu.memory_space<vmem>>, vector<4x32xf32>
    %c0_36 = arith.constant 0 : index
    %c0_37 = arith.constant 0 : index
    %c0_38 = arith.constant 0 : index
    %37 = vector.load %arg5[%c0_36, %c0_37, %c0_38] : memref<1x32x256xf32, #tpu.memory_space<vmem>>, vector<1x32x256xf32>
    %38 = vector.shape_cast %37 : vector<1x32x256xf32> to vector<32x256xf32>
    %cst_39 = arith.constant dense<0.000000e+00> : vector<4x256xf32>
    %39 = tpu.matmul %36, %38, %cst_39 {dimension_numbers = #tpu.dot_dimension_numbers<[1], [0], [0], [1], [0, 0, 1, 1], [], []>} : vector<4x32xf32>, vector<32x256xf32>, vector<4x256xf32> -> vector<4x256xf32>
    %c0_40 = arith.constant 0 : index
    %c0_41 = arith.constant 0 : index
    %40 = vector.load %arg15[%c0_40, %c0_41] : memref<4x1xf32, #tpu.memory_space<vmem>>, vector<4x1xf32>
    %41 = vector.broadcast %40 : vector<4x1xf32> to vector<4x256xf32>
    %42 = arith.addf %39, %41 : vector<4x256xf32>
    %cst_42 = arith.constant 0.000000e+00 : f32
    %43 = vector.broadcast %cst_42 : f32 to vector<4x256xf32>
    %44 = arith.maximumf %42, %43 : vector<4x256xf32>
    %c0_43 = arith.constant 0 : index
    %c0_44 = arith.constant 0 : index
    %c0_45 = arith.constant 0 : index
    %45 = vector.load %arg20[%c0_43, %c0_44, %c0_45] : memref<1x4x256xf32, #tpu.memory_space<vmem>>, vector<1x4x256xf32>
    %46 = vector.shape_cast %45 : vector<1x4x256xf32> to vector<4x256xf32>
    %47 = vector.shape_cast %44 : vector<4x256xf32> to vector<1x4x256xf32>
    tpu.vector_store %arg20[%c0_43, %c0_44, %c0_45], %47 {strides = array<i32>} : memref<1x4x256xf32, #tpu.memory_space<vmem>>, vector<1x4x256xf32>,
    %c0_46 = arith.constant 0 : index
    %c0_47 = arith.constant 0 : index
    %48 = vector.load %arg11[%c0_46, %c0_47] : memref<4x32xf32, #tpu.memory_space<vmem>>, vector<4x32xf32>
    %c0_48 = arith.constant 0 : index
    %c0_49 = arith.constant 0 : index
    %c0_50 = arith.constant 0 : index
    %49 = vector.load %arg6[%c0_48, %c0_49, %c0_50] : memref<1x32x256xf32, #tpu.memory_space<vmem>>, vector<1x32x256xf32>
    %50 = vector.shape_cast %49 : vector<1x32x256xf32> to vector<32x256xf32>
    %cst_51 = arith.constant dense<0.000000e+00> : vector<4x256xf32>
    %51 = tpu.matmul %48, %50, %cst_51 {dimension_numbers = #tpu.dot_dimension_numbers<[1], [0], [0], [1], [0, 0, 1, 1], [], []>} : vector<4x32xf32>, vector<32x256xf32>, vector<4x256xf32> -> vector<4x256xf32>
    %c0_52 = arith.constant 0 : index
    %c0_53 = arith.constant 0 : index
    %52 = vector.load %arg16[%c0_52, %c0_53] : memref<4x1xf32, #tpu.memory_space<vmem>>, vector<4x1xf32>
    %53 = vector.broadcast %52 : vector<4x1xf32> to vector<4x256xf32>
    %54 = arith.addf %51, %53 : vector<4x256xf32>
    %cst_54 = arith.constant 0.000000e+00 : f32
    %55 = vector.broadcast %cst_54 : f32 to vector<4x256xf32>
    %56 = arith.maximumf %54, %55 : vector<4x256xf32>
    %c0_55 = arith.constant 0 : index
    %c0_56 = arith.constant 0 : index
    %c0_57 = arith.constant 0 : index
    %57 = vector.load %arg21[%c0_55, %c0_56, %c0_57] : memref<1x4x256xf32, #tpu.memory_space<vmem>>, vector<1x4x256xf32>
    %58 = vector.shape_cast %57 : vector<1x4x256xf32> to vector<4x256xf32>
    %59 = vector.shape_cast %56 : vector<4x256xf32> to vector<1x4x256xf32>
    tpu.vector_store %arg21[%c0_55, %c0_56, %c0_57], %59 {strides = array<i32>} : memref<1x4x256xf32, #tpu.memory_space<vmem>>, vector<1x4x256xf32>,
    return
  }
  func.func @transform_0(%arg0: i32, %arg1: i32) -> (i32, i32, i32) {
    %c0_i32 = arith.constant 0 : i32
    %c0_i32_0 = arith.constant 0 : i32
    return %arg0, %c0_i32, %arg1 : i32, i32, i32
  }
  func.func @transform_1(%arg0: i32, %arg1: i32) -> (i32, i32, i32) {
    %c0_i32 = arith.constant 0 : i32
    %c0_i32_0 = arith.constant 0 : i32
    return %arg0, %c0_i32, %arg1 : i32, i32, i32
  }
  func.func @transform_2(%arg0: i32, %arg1: i32) -> (i32, i32, i32) {
    %c0_i32 = arith.constant 0 : i32
    %c0_i32_0 = arith.constant 0 : i32
    return %arg0, %c0_i32, %arg1 : i32, i32, i32
  }
  func.func @transform_3(%arg0: i32, %arg1: i32) -> (i32, i32, i32) {
    %c0_i32 = arith.constant 0 : i32
    %c0_i32_0 = arith.constant 0 : i32
    return %arg0, %c0_i32, %arg1 : i32, i32, i32
  }
  func.func @transform_4(%arg0: i32, %arg1: i32) -> (i32, i32, i32) {
    %c0_i32 = arith.constant 0 : i32
    %c0_i32_0 = arith.constant 0 : i32
    return %arg0, %c0_i32, %arg1 : i32, i32, i32
  }
  func.func @transform_5(%arg0: i32, %arg1: i32) -> (i32, i32) {
    %c0_i32 = arith.constant 0 : i32
    %c0_i32_0 = arith.constant 0 : i32
    %c0_i32_1 = arith.constant 0 : i32
    return %c0_i32, %c0_i32_0 : i32, i32
  }
  func.func @transform_6(%arg0: i32, %arg1: i32) -> (i32, i32) {
    %c0_i32 = arith.constant 0 : i32
    %c0_i32_0 = arith.constant 0 : i32
    %c0_i32_1 = arith.constant 0 : i32
    return %c0_i32, %c0_i32_0 : i32, i32
  }
  func.func @transform_7(%arg0: i32, %arg1: i32) -> (i32, i32) {
    %c0_i32 = arith.constant 0 : i32
    %c0_i32_0 = arith.constant 0 : i32
    %c0_i32_1 = arith.constant 0 : i32
    return %c0_i32, %c0_i32_0 : i32, i32
  }
  func.func @transform_8(%arg0: i32, %arg1: i32) -> (i32, i32) {
    %c0_i32 = arith.constant 0 : i32
    %c0_i32_0 = arith.constant 0 : i32
    %c0_i32_1 = arith.constant 0 : i32
    return %c0_i32, %c0_i32_0 : i32, i32
  }
  func.func @transform_9(%arg0: i32, %arg1: i32) -> (i32, i32) {
    %c0_i32 = arith.constant 0 : i32
    %c0_i32_0 = arith.constant 0 : i32
    %c0_i32_1 = arith.constant 0 : i32
    return %c0_i32, %c0_i32_0 : i32, i32
  }
  func.func @transform_10(%arg0: i32, %arg1: i32) -> (i32, i32) {
    %c0_i32 = arith.constant 0 : i32
    %c0_i32_0 = arith.constant 0 : i32
    %c0_i32_1 = arith.constant 0 : i32
    return %c0_i32, %c0_i32_0 : i32, i32
  }
  func.func @transform_11(%arg0: i32, %arg1: i32) -> (i32, i32) {
    %c0_i32 = arith.constant 0 : i32
    %c0_i32_0 = arith.constant 0 : i32
    %c0_i32_1 = arith.constant 0 : i32
    return %c0_i32, %c0_i32_0 : i32, i32
  }
  func.func @transform_12(%arg0: i32, %arg1: i32) -> (i32, i32) {
    %c0_i32 = arith.constant 0 : i32
    %c0_i32_0 = arith.constant 0 : i32
    %c0_i32_1 = arith.constant 0 : i32
    return %c0_i32, %c0_i32_0 : i32, i32
  }
  func.func @transform_13(%arg0: i32, %arg1: i32) -> (i32, i32) {
    %c0_i32 = arith.constant 0 : i32
    %c0_i32_0 = arith.constant 0 : i32
    %c0_i32_1 = arith.constant 0 : i32
    return %c0_i32, %c0_i32_0 : i32, i32
  }
  func.func @transform_14(%arg0: i32, %arg1: i32) -> (i32, i32) {
    %c0_i32 = arith.constant 0 : i32
    %c0_i32_0 = arith.constant 0 : i32
    %c0_i32_1 = arith.constant 0 : i32
    return %c0_i32, %c0_i32_0 : i32, i32
  }
  func.func @transform_15(%arg0: i32, %arg1: i32) -> (i32, i32, i32) {
    %c0_i32 = arith.constant 0 : i32
    %c0_i32_0 = arith.constant 0 : i32
    return %arg0, %c0_i32, %arg1 : i32, i32, i32
  }
  func.func @transform_16(%arg0: i32, %arg1: i32) -> (i32, i32, i32) {
    %c0_i32 = arith.constant 0 : i32
    %c0_i32_0 = arith.constant 0 : i32
    return %arg0, %c0_i32, %arg1 : i32, i32, i32
  }
  func.func @transform_17(%arg0: i32, %arg1: i32) -> (i32, i32, i32) {
    %c0_i32 = arith.constant 0 : i32
    %c0_i32_0 = arith.constant 0 : i32
    return %arg0, %c0_i32, %arg1 : i32, i32, i32
  }
  func.func @transform_18(%arg0: i32, %arg1: i32) -> (i32, i32, i32) {
    %c0_i32 = arith.constant 0 : i32
    %c0_i32_0 = arith.constant 0 : i32
    return %arg0, %c0_i32, %arg1 : i32, i32, i32
  }
  func.func @transform_19(%arg0: i32, %arg1: i32) -> (i32, i32, i32) {
    %c0_i32 = arith.constant 0 : i32
    %c0_i32_0 = arith.constant 0 : i32
    return %arg0, %c0_i32, %arg1 : i32, i32, i32
  }
}

</mosaic_0001>

<bundles_post_ra>
// kernel: one_conv_forward.1
= control target key start
LH: loop header
LB: loop body
LE: loop exit
PB: predicated region body
PF: predicated region fallthrough
CT: control target
= control target key end

     0   :  { %s1933_s30 = smov 0   ;;  %s1935_s20 = smov 0   ;;  %s2061_s0 = inlined_call_operand.vmem [shape: f32[2,4,256], index: 0, kind: input, shape index: {}]   ;;  %s2062_s1 = inlined_call_operand.vmem [shape: f32[2,8,256], index: 1, kind: input, shape index: {}]   ;;  %s2063_s2 = inlined_call_operand.vmem [shape: f32[2,16,256], index: 2, kind: input, shape index: {}]   ;;  %s2064_s3 = inlined_call_operand.vmem [shape: f32[2,32,256], index: 3, kind: input, shape index: {}]   ;;  %s2065_s4 = inlined_call_operand.vmem [shape: f32[2,32,256], index: 4, kind: input, shape index: {}]   ;;  %s2066_s5 = inlined_call_operand.vmem [shape: f32[4,4], index: 5, kind: input, shape index: {}]   ;;  %s2067_s6 = inlined_call_operand.vmem [shape: f32[4,8], index: 6, kind: input, shape index: {}]   ;;  %s2068_s7 = inlined_call_operand.vmem [shape: f32[4,16], index: 7, kind: input, shape index: {}]   ;;  %s2069_s8 = inlined_call_operand.vmem [shape: f32[4,32], index: 8, kind: input, shape index: {}]   ;;  %s2070_s9 = inlined_call_operand.vmem [shape: f32[4,32], index: 9, kind: input, shape index: {}]   ;;  %s2071_s10 = inlined_call_operand.vmem [shape: f32[4,1], index: 10, kind: input, shape index: {}]   ;;  %s2072_s11 = inlined_call_operand.vmem [shape: f32[4,1], index: 11, kind: input, shape index: {}]   ;;  %s2073_s12 = inlined_call_operand.vmem [shape: f32[4,1], index: 12, kind: input, shape index: {}]   ;;  %s2074_s13 = inlined_call_operand.vmem [shape: f32[4,1], index: 13, kind: input, shape index: {}]   ;;  %s2075_s14 = inlined_call_operand.vmem [shape: f32[4,1], index: 14, kind: input, shape index: {}]   ;;  %s2076_s15 = inlined_call_operand.vmem [shape: f32[2,4,256], index: 15, kind: output, shape index: {0}]   ;;  %s2077_s16 = inlined_call_operand.vmem [shape: f32[2,4,256], index: 16, kind: output, shape index: {1}]   ;;  %s2078_s17 = inlined_call_operand.vmem [shape: f32[2,4,256], index: 17, kind: output, shape index: {2}]   ;;  %s2079_s18 = inlined_call_operand.vmem [shape: f32[2,4,256], index: 18, kind: output, shape index: {3}]   ;;  %s2080_s19 = inlined_call_operand.vmem [shape: f32[2,4,256], index: 19, kind: output, shape index: {4}]  }
   0x1   :  { %2082 = sst [smem:[#allocation4_spill]] %s2061_s0  ;;  %s1931_s0 = smov 0  }
   0x2   :  { %2083 = sst [smem:[#allocation5_spill]] %s2062_s1 }
   0x3   :  { %2084 = sst [smem:[#allocation6_spill]] %s2063_s2 }
   0x4   :  { %2085 = sst [smem:[#allocation7_spill]] %s2064_s3 }
   0x5   :  { %2086 = sst [smem:[#allocation8_spill]] %s2067_s6 }
   0x6   :  { %2087 = sst [smem:[#allocation9_spill]] %s2071_s10 }
   0x7 LB: > { %2088 = sst [smem:[#allocation2_spill]] %s1823_s30  ;;  %s42_s21 = sadd.s32 1, %s1823_s30  ;;  %s1827_s20 = sphi %s1935_s20, %s30_s20   ;;  %s1823_s30 = sphi %s1933_s30, %s2097_s30   ;;  %s1819_s0 = sphi %s1931_s0, %s2096_s0  }
   0x8   : > { %p1716_p0 = scmp.ge.s32.totalorder %s1827_s20, 1  ;;  %p44_p1 = scmp.ge.s32.totalorder %s42_s21, 2 }
   0x9   : > { %p643_p2 = scmp.lt.s32.totalorder %s1827_s20, 3 }
   0xa   : > { %s2099_s21 = smov (%p44_p1, %s42_s21), 0 }
   0xb   : > { %2089 = sst [smem:[#allocation3_spill]] %s2099_s21  ;;  %p644_p3 = pnand %p1716_p0, %p643_p2 }
   0xc   : > { %p780_p4 = scmp.lt.s32.totalorder (!%p644_p3), %s1819_s0, 1  ;;  %v1829_v0 = vmov (!%p644_p3), 0.0   ;;  %s2090_s10 = sld [smem:[#allocation9_spill]] (!%p644_p3)  ;;  %v1830_v2 = vmov (!%p644_p3), 0   ;;  %v1072_v3 = vld [vmem:[%s2073_s12] sm:$0xf] (!%p644_p3) }
   0xd   : > { %647 = sbr.rel (%p644_p3) target bundleno = 262 (0x106), region = 80  ;;  %962 = vmatprep.mubr.f32.mxu0 (!%p644_p3), %v1829_v0  ;;  %1053 = vmatprep.mubr.f32.mxu1 (!%p644_p3), %v1829_v0  ;;  %s2091_s27 = sld [smem:[#allocation4_spill]] (!%p644_p3)  ;;  %vm893_vm0 = vcmask (!%p644_p3), 1043456   ;;  %vm985_vm1 = vcmask (!%p644_p3), 64512   ;;  %v879_v9 = vld [vmem:[%s2066_s5] sm:$0xf] (!%p644_p3) }
   0xe   : > { %1802 = vset.pattern.permute.xlu0 (!%p644_p3), %v1830_v2  ;;  %1803 = vset.pattern.permute.xlu1 (!%p644_p3), %v1830_v2  ;;  %s2092_s22 = sld [smem:[#allocation5_spill]] (!%p644_p3)  ;;  %s2093_s6 = sld [smem:[#allocation8_spill]] (!%p644_p3)  ;;  %vm889_vm2 = vcmask (!%p644_p3), 31744   ;;  %v1067_v21 = vld [vmem:[%s2068_s7] sm:$0xf] (!%p644_p3)  ;;  %vm1078_vm3 = vcmask (!%p644_p3), 130048  }
   0xf   : > { %1075 = vperm.xlu1 (!%p644_p3), %1803, %v1072_v3   ;;  %s2094_s29 = sld [smem:[#allocation6_spill]] (!%p644_p3)  ;;  %v979_v23 = vld [vmem:[%s2072_s11] sm:$0xf] (!%p644_p3)  ;;  %vm1175_vm4 = vcmask (!%p644_p3), 261120  }
  0x10   : > { %v1169_v41 = vld [vmem:[%s2074_s13] sm:$0xf] (!%p644_p3) }
  0x11   : > { %v1266_v43 = vld [vmem:[%s2075_s14] sm:$0xf] (!%p644_p3) }
  0x12   : > { %v881_v1 = vld [vmem:[%s2090_s10] sm:$0xf] (!%p644_p3) }
  0x13   : > { %884 = vperm.xlu0 (!%p644_p3), %1802, %v881_v1   ;;  %v1160_v44 = vld [vmem:[%s2069_s8] sm:$0xf] (!%p644_p3)  ;;  %1172 = vperm.xlu1 (!%p644_p3), %1803, %v1169_v41  }
  0x14   : > { %s2101_s0 = smov (!%p780_p4, %s1819_s0), 1  ;;  %v976_v4 = vld [vmem:[%s2093_s6] sm:$0xf] }
  0x15   : > { %s1957_s2 = sshll.u32 %s2101_s0, 3  ;;  %s1747_s23 = sshll.u32 %s2101_s0, 4  ;;  %v1257_v45 = vld [vmem:[%s2070_s9] sm:$0xf] }
  0x16   : > { %s787_s28 = scalar_lea.vmem %s2091_s27, %s1957_s2  ;;  %s797_s10 = scalar_lea.vmem %s2092_s22, %s1747_s23 }
  0x17   : > { %v880_v5 = vld [vmem:[%s787_s28] sm:$0xff]  ;;  %v978_v6 = vld [vmem:[%s797_s10 + $0x8] sm:$0xff]  ;;  %s1748_s24 = sshll.u32 %s2101_s0, 5  ;;  %s1749_s25 = sshll.u32 %s2101_s0, 6  ;;  %982 = vperm.xlu0 %1802, %v979_v23  }
  0x18   : > { %v977_v7 = vld [vmem:[%s797_s10] sm:$0xff]  ;;  %v888_v8 = vcombine.high %v880_v5, %v880_v5  ;;  %989 = vmatprep.subr.mxu1 %v978_v6  ;;  %s807_s1 = scalar_lea.vmem %s2094_s29, %s1748_s24  ;;  %s2095_s22 = sld [smem:[#allocation7_spill]] }
  0x19   : > { %990 = vmatpush1.msra.mxu1 %v977_v7  ;;  %v1069_v10 = vld [vmem:[%s807_s1 + $0x8] sm:$0xff]  ;;  %v1071_v11 = vld [vmem:[%s807_s1 + $0x18] sm:$0xff]  ;;  %s1990_s28 = scalar_lea.vmem %s2065_s4, %s1749_s25  ;;  %v1068_v15 = vld [vmem:[%s807_s1] sm:$0xff]  ;;  %s857_s23 = scalar_lea.vmem %s2078_s17, %s1957_s2 }
  0x1a   : > { %1737 = vmatprep.subr.msk.mxu0 %vm893_vm0, %v888_v8  ;;  %v1756_v13 = vpack.c.bf16 %v1071_v11, %v1069_v10  ;;  %1740 = vmatmul.mubr.msk.f32.vlgmr.msra.gmra.mrb[0].mxu1 %vm985_vm1, %v976_v4  ;;  %v1070_v16 = vld [vmem:[%s807_s1 + $0x10] sm:$0xff]  ;;  %v1259_v26 = vld [vmem:[%s1990_s28 + $0x8] sm:$0xff]  ;;  %v1261_v27 = vld [vmem:[%s1990_s28 + $0x18] sm:$0xff]  ;;  %s867_s1 = scalar_lea.vmem %s2079_s18, %s1957_s2 }
  0x1b   : > { %1738 = vmatpush1.msk.msra.mxu0 %vm893_vm0, %v880_v5  ;;  %v1758_v18 = vpack.c.bf16 %v1070_v16, %v1068_v15  ;;  %1243 = vmatprep.mubr.f32.mxu1 %v1829_v0  ;;  %v1768_v29 = vpack.c.bf16 %v1261_v27, %v1259_v26  ;;  %v1258_v32 = vld [vmem:[%s1990_s28] sm:$0xff]  ;;  %v1260_v34 = vld [vmem:[%s1990_s28 + $0x10] sm:$0xff]  ;;  %v1263_v35 = vld [vmem:[%s1990_s28 + $0x28] sm:$0xff] }
  0x1c   : > { %1739 = vmatmul.mubr.msk.f32.vlgmr.msra.gmra.mrb[0].mxu0 %vm889_vm2, %v879_v9  ;;  %1757 = vmatprep.subr.bf16.mxu0 %v1756_v13  ;;  %v1265_v36 = vld [vmem:[%s1990_s28 + $0x38] sm:$0xff]  ;;  %v1770_v37 = vpack.c.bf16 %v1260_v34, %v1258_v32  ;;  %v1262_v39 = vld [vmem:[%s1990_s28 + $0x20] sm:$0xff]  ;;  %v1264_v40 = vld [vmem:[%s1990_s28 + $0x30] sm:$0xff]  ;;  %s847_s28 = scalar_lea.vmem %s2077_s16, %s1957_s2 }
  0x1d   : > { %1759 = vmatpush1.bf16.msra.mxu0 %v1758_v18  ;;  %1146 = vmatprep.mubr.f32.mxu0 %v1829_v0  ;;  %v1772_v38 = vpack.c.bf16 %v1265_v36, %v1263_v35  ;;  %v1774_v42 = vpack.c.bf16 %v1264_v40, %v1262_v39 }
  0x1e   : > { %s1984_s6 = scalar_lea.vmem %s2095_s22, %s1749_s25  ;;  %1769 = vmatprep.subr.bf16.mxu0 %v1768_v29  ;;  %1269 = vperm.xlu0 %1802, %v1266_v43   ;;  %s837_s25 = scalar_lea.vmem %s2076_s15, %s1957_s2 }
  0x1f   : > { %v1162_v12 = vld [vmem:[%s1984_s6 + $0x8] sm:$0xff]  ;;  %v1164_v14 = vld [vmem:[%s1984_s6 + $0x18] sm:$0xff]  ;;  %v1161_v19 = vld [vmem:[%s1984_s6] sm:$0xff]  ;;  %s877_s22 = scalar_lea.vmem %s2080_s19, %s1957_s2 }
  0x20   : > { %v1760_v17 = vpack.c.bf16 %v1164_v14, %v1162_v12  ;;  %v1163_v20 = vld [vmem:[%s1984_s6 + $0x10] sm:$0xff]  ;;  %v1166_v22 = vld [vmem:[%s1984_s6 + $0x28] sm:$0xff]  ;;  %v1168_v25 = vld [vmem:[%s1984_s6 + $0x38] sm:$0xff]  ;;  %1741 = vmatmul.mubr.msk.f32.vlgmr.msra.gmra.mrb[2].mxu0 %vm1078_vm3, %v1067_v21 }
  0x21   : > { %v1762_v24 = vpack.c.bf16 %v1163_v20, %v1161_v19  ;;  %v1764_v28 = vpack.c.bf16 %v1168_v25, %v1166_v22  ;;  %v1165_v30 = vld [vmem:[%s1984_s6 + $0x20] sm:$0xff]  ;;  %v1167_v31 = vld [vmem:[%s1984_s6 + $0x30] sm:$0xff]  ;;  %1771 = vmatpush1.bf16.msra.mxu0 %v1770_v37  ;;  %1339 = vmatprep.mubr.f32.mxu0 %v1829_v0 }
  0x22   : > { %1761 = vmatprep.subr.bf16.mxu1 %v1760_v17  ;;  %v1766_v33 = vpack.c.bf16 %v1167_v31, %v1165_v30  ;;  %1773 = vmatprep.subr.bf16.mxu0 %v1772_v38 }
  0x23   : > { %1763 = vmatpush1.bf16.msra.mxu1 %v1762_v24 }
  0x24   : > { %1765 = vmatprep.subr.bf16.mxu1 %v1764_v28 }
  0x25   : > { %1775 = vmatpush1.bf16.msra.mxu0 %v1774_v42 }
  0x27   : > { %1767 = vmatpush1.bf16.msra.mxu1 %v1766_v33 }
  0x28   : > { %1743 = vmatmul.mubr.msk.f32.vlgmr.msra.gmra.mrb[4].mxu0 %vm1175_vm4, %v1257_v45 }
  0x2a   : > { %1742 = vmatmul.mubr.msk.f32.vlgmr.msra.gmra.mrb[2].mxu1 %vm1175_vm4, %v1160_v44 }
  0x8e   : > { %v1076_v56 = vpop.permute.xlu1 %1075 }
  0x92   : > { %v885_v46 = vpop.permute.xlu0 %884  ;;  %v1173_v4 = vpop.permute.xlu1 %1172 }
  0x96   : > { %v983_v47 = vpop.permute.xlu0 %982 }
  0x9d   : > { %v1270_v11 = vpop.permute.xlu0 %1269 }
  0xed   : > { %v1055_v48 = vpop.f32.mrb[0].mxu1 }
  0xee   : > { %v1056_v49 = vadd.f32 %v1055_v48, %v983_v47  ;;  %v1057_v50 = vpop.f32.mrb[1].mxu1 }
  0xef   : > { %v964_v51 = vpop.f32.mrb[0].mxu0  ;;  %v1058_v52 = vadd.f32 %v1057_v50, %v983_v47 }
  0xf0   : > { %v965_v53 = vadd.f32 %v964_v51, %v885_v46  ;;  %v966_v54 = vpop.f32.mrb[1].mxu0  ;;  %v1060_v55 = vmax.f32 %v1056_v49, 0.0 }
  0xf1   : > { %v967_v57 = vadd.f32 %v966_v54, %v885_v46  ;;  %v1061_v58 = vmax.f32 %v1058_v52, 0.0 }
  0xf2   : > { %v969_v59 = vmax.f32 %v965_v53, 0.0 }
  0xf3   : > { %v970_v60 = vmax.f32 %v967_v57, 0.0  ;;  %v1148_v61 = vpop.f32.mrb[2].mxu0  ;;  %v1064_v62 = vcombine.low %v1060_v55, %v1061_v58 }
  0xf4   : > { %v1149_v63 = vadd.f32 %v1148_v61, %v1076_v56  ;;  %v1150_v0 = vpop.f32.mrb[3].mxu0 }
  0xf5   : > { %v973_v1 = vcombine.low %v969_v59, %v970_v60  ;;  %1066 = vst [vmem:[%s847_s28] sm:$0xff] %v1064_v62  ;;  %v1151_v2 = vadd.f32 %v1150_v0, %v1076_v56 }
  0xf6   : > { %v1153_v3 = vmax.f32 %v1149_v63, 0.0 }
  0xf7   : > { %975 = vst [vmem:[%s837_s25] sm:$0xff] %v973_v1  ;;  %v1154_v5 = vmax.f32 %v1151_v2, 0.0 }
  0xf9   : > { %v1157_v7 = vcombine.low %v1153_v3, %v1154_v5 }
  0xfb   : > { %1159 = vst [vmem:[%s857_s23] sm:$0xff] %v1157_v7  ;;  %v1341_v13 = vpop.f32.mrb[4].mxu0 }
  0xfc   : > { %v1342_v15 = vadd.f32 %v1341_v13, %v1270_v11  ;;  %v1343_v16 = vpop.f32.mrb[5].mxu0 }
  0xfd   : > { %v1245_v6 = vpop.f32.mrb[2].mxu1  ;;  %v1344_v17 = vadd.f32 %v1343_v16, %v1270_v11 }
  0xfe   : > { %v1246_v8 = vadd.f32 %v1245_v6, %v1173_v4  ;;  %v1247_v9 = vpop.f32.mrb[3].mxu1  ;;  %v1346_v19 = vmax.f32 %v1342_v15, 0.0 }
  0xff   : > { %v1248_v10 = vadd.f32 %v1247_v9, %v1173_v4  ;;  %v1347_v20 = vmax.f32 %v1344_v17, 0.0 }
 0x100   : > { %v1250_v12 = vmax.f32 %v1246_v8, 0.0 }
 0x101   : > { %v1251_v14 = vmax.f32 %v1248_v10, 0.0  ;;  %v1350_v21 = vcombine.low %v1346_v19, %v1347_v20 }
 0x103   : > { %v1254_v18 = vcombine.low %v1250_v12, %v1251_v14  ;;  %1352 = vst [vmem:[%s877_s22] sm:$0xff] %v1350_v21 }
 0x105   : > { %1256 = vst [vmem:[%s867_s1] sm:$0xff] %v1254_v18 }
 0x106 PF: > { %s30_s20 = sadd.s32 1, %s1827_s20   ;;  %s2096_s0 = sld [smem:[#allocation2_spill]] }
 0x107   : > { %p27_p5 = scmp.ge.s32.totalorder %s30_s20, 4   ;;  %s2097_s30 = sld [smem:[#allocation3_spill]] }
 0x109   :  { %29 = sbr.rel (!%p27_p5) target bundleno = 7 (0x7), region = 170 }

</bundles_post_ra>
